<compile_context>
chip_gen: v6e
topology: v6e:2x2x1
jax: 0.10.0
libtpu: 0.0.40
codegen_flags: <defaults>
</compile_context>

<pallas_src>
import functools

import jax
import jax.numpy as jnp
from jax.experimental import pallas as pl
from jax.experimental.pallas import tpu as pltpu

_LANES = 128
_SUBLANES = 8


def _round_up(x, m):
    return ((x + m - 1) // m) * m


def _two_head_loss_kernel(logits_ref, labels_ref, w_ref, pred_ref, tgt_ref,
                          out_ref, acc_ref, *, ce_w, recon_w, inv_md):
    """Fused weighted-CE + MSE + weighted-sum kernel.

    Grid axis 0 streams reconstruction tiles (reduction axis).  The small
    classification blocks use a constant index_map, so they are DMA'd once and
    stay VMEM-resident; they are consumed in the finalize step only.
    """
    i = pl.program_id(0)

    @pl.when(i == 0)
    def _init():
        acc_ref[...] = jnp.zeros_like(acc_ref)

    # ---- MSE partial sums: lane-dense (tm//8, 8, 128) tile, VPU-only ----
    d = pred_ref[...] - tgt_ref[...]            # f32, padded tail is 0 - 0
    acc_ref[...] += jnp.sum(d * d, axis=0)      # vreg-wise adds into (8, 128)

    # ---- finalize: CE block + one cross-lane reduce + weighted sum ----
    @pl.when(i == pl.num_programs(0) - 1)
    def _finalize():
        x = logits_ref[...].astype(jnp.float32)       # (N, C)
        labels = labels_ref[...]                      # (N, 1) int32
        w = w_ref[...].astype(jnp.float32)            # (1, C)

        # log-sum-exp (numerically stable)
        m = jnp.max(x, axis=-1, keepdims=True)
        lse = jnp.log(jnp.sum(jnp.exp(x - m), axis=-1, keepdims=True)) + m

        # weighted one-hot via iota compare (no dynamic gather on TPU)
        iota = jax.lax.broadcasted_iota(jnp.int32, x.shape, 1)
        wh = (iota == labels).astype(jnp.float32) * w          # (N, C)
        den = jnp.sum(wh)                                      # sum_i w[y_i]
        num = jnp.sum(wh * (lse - x))                          # sum_i w[y_i]*nll_i
        ce = num / den                                         # NaN if den==0 (matches torch)

        recon = jnp.sum(acc_ref[...]) * inv_md
        loss = ce_w * ce + recon_w * recon

        out_ref[0] = loss
        out_ref[1] = ce
        out_ref[2] = recon


def two_head_loss_fused(cl_logits, recon_pred, recon_tgt, labels,
                        class_weights, *, ce_loss_weight, recon_weight,
                        tile_rows=2048):
    """Single fused pallas_call returning (loss, ce, recon)."""
    # --- classification head operands (tiny, single resident block) ---
    logits = jnp.squeeze(jnp.asarray(cl_logits, jnp.float32))
    if logits.ndim == 1:
        # single-sample case after .squeeze(): treat as one row
        logits = logits[None, :]
    n, c = logits.shape
    labels2d = jnp.asarray(labels, jnp.int32).reshape(n, 1)
    w2d = jnp.asarray(class_weights, jnp.float32).reshape(1, c)
    # TODO(synk): if N ever becomes large, tile the CE block over N as well.

    # --- reconstruction head operands: flatten to lane-dense (rows, 8, 128) ---
    pred_flat = jnp.asarray(recon_pred, jnp.float32).reshape(-1)
    tgt_flat = jnp.asarray(recon_tgt, jnp.float32).reshape(-1)
    total = pred_flat.shape[0]                       # true M*D (static)

    tile_rows = _round_up(int(tile_rows), _SUBLANES)
    rows = -(-total // _LANES)                       # cdiv
    tm = min(tile_rows, _round_up(max(rows, _SUBLANES), _SUBLANES))
    rows_padded = _round_up(rows, tm)
    pad = rows_padded * _LANES - total
    if pad:
        # zero padding contributes 0 to the squared-error sum
        pred_flat = jnp.pad(pred_flat, (0, pad))
        tgt_flat = jnp.pad(tgt_flat, (0, pad))
    pred3d = pred_flat.reshape(rows_padded // _SUBLANES, _SUBLANES, _LANES)
    tgt3d = tgt_flat.reshape(rows_padded // _SUBLANES, _SUBLANES, _LANES)
    num_tiles = rows_padded // tm
    blk = tm // _SUBLANES

    kernel = functools.partial(
        _two_head_loss_kernel,
        ce_w=float(ce_loss_weight),
        recon_w=float(recon_weight),
        inv_md=1.0 / float(total),
    )

    out = pl.pallas_call(
        kernel,
        out_shape=jax.ShapeDtypeStruct((3,), jnp.float32),
        grid_spec=pltpu.PrefetchScalarGridSpec(
            num_scalar_prefetch=0,
            grid=(num_tiles,),
            in_specs=[
                pl.BlockSpec((n, c), lambda i: (0, 0)),        # logits (resident)
                pl.BlockSpec((n, 1), lambda i: (0, 0)),        # labels (resident)
                pl.BlockSpec((1, c), lambda i: (0, 0)),        # class weights
                pl.BlockSpec((blk, _SUBLANES, _LANES), lambda i: (i, 0, 0)),
                pl.BlockSpec((blk, _SUBLANES, _LANES), lambda i: (i, 0, 0)),
            ],
            out_specs=pl.BlockSpec(memory_space=pltpu.MemorySpace.SMEM),
            scratch_shapes=[pltpu.VMEM((_SUBLANES, _LANES), jnp.float32)],
        ),
        compiler_params=pltpu.CompilerParams(
            dimension_semantics=("arbitrary",)),
    )(logits, labels2d, w2d, pred3d, tgt3d)

    return out[0], out[1], out[2]


class TwoHeadLoss:
    """JAX / Pallas equivalent of the PyTorch TwoHeadLoss forward pass."""

    def __init__(self, ce_loss_weight, recon_weight, ce_label_weights):
        self.ce_loss_weight = float(ce_loss_weight)
        self.recon_weight = float(recon_weight)
        self.ce_label_weights = jnp.asarray(ce_label_weights, dtype=jnp.float32)
        # Weights are trace-time constants -> bake into the fused kernel, jit
        # the whole compute (single device launch, no host sync inside).
        self._loss = jax.jit(functools.partial(
            two_head_loss_fused,
            ce_loss_weight=self.ce_loss_weight,
            recon_weight=self.recon_weight,
        ))

    def __call__(self, cl_logits, recon_output, recon_targets, labels,
                 label_obs=None):
        # Host-side precondition (outside the jitted hot path), mirroring the
        # PyTorch module's ValueError on unlabelled data.
        if label_obs is not None:
            if not bool(jax.device_get(jnp.all(jnp.asarray(label_obs) > 0))):
                raise ValueError("Error, this loss can't use unlabelled data.")
        return self._loss(cl_logits, recon_output, recon_targets, labels,
                          self.ce_label_weights)


if __name__ == "__main__":
    key = jax.random.PRNGKey(0)
    k1, k2, k3, k4 = jax.random.split(key, 4)

    N, C = 8, 4          # classification head: 8 samples, 4 classes
    M, D = 128, 32       # reconstruction head: 128 points, 32 feature channels

    cl_logits = jax.random.normal(k1, (N, C), dtype=jnp.float32)
    labels = jax.random.randint(k2, (N,), 0, C, dtype=jnp.int32)
    recon_out = jax.random.normal(k3, (M, D), dtype=jnp.float32)
    recon_tgt = jax.random.normal(k4, (M, D), dtype=jnp.float32)
    label_obs = jnp.ones((N,), dtype=jnp.int32)

    ce_label_weights = [1.0, 2.0, 0.5, 1.5]
    loss_fn = TwoHeadLoss(ce_loss_weight=0.7, recon_weight=0.3,
                          ce_label_weights=ce_label_weights)

    loss, ce, recon = loss_fn(cl_logits, recon_out, recon_tgt, labels,
                              label_obs=label_obs)
    jax.block_until_ready((loss, ce, recon))

    # Pure-JAX reference to guard semantics.
    w = jnp.asarray(ce_label_weights, jnp.float32)
    logp = jax.nn.log_softmax(cl_logits, axis=-1)
    per_w = w[labels]
    ce_ref = jnp.sum(per_w * (-logp[jnp.arange(N), labels])) / jnp.sum(per_w)
    mse_ref = jnp.mean((recon_out - recon_tgt) ** 2)
    loss_ref = 0.7 * ce_ref + 0.3 * mse_ref
    assert jnp.allclose(ce, ce_ref, rtol=1e-5, atol=1e-5)
    assert jnp.allclose(recon, mse_ref, rtol=1e-5, atol=1e-5)
    assert jnp.allclose(loss, loss_ref, rtol=1e-5, atol=1e-5)

    print("KERNEL_OK")
</pallas_src>

<mosaic_0001>
module attributes {stable_mosaic.version = 11 : i64} {
  func.func @_two_head_loss_kernel(%arg0: i32, %arg1: memref<8x4xf32, #tpu.memory_space<vmem>>, %arg2: memref<8x1xi32, #tpu.memory_space<vmem>>, %arg3: memref<1x4xf32, #tpu.memory_space<vmem>>, %arg4: memref<4x8x128xf32, #tpu.memory_space<vmem>>, %arg5: memref<4x8x128xf32, #tpu.memory_space<vmem>>, %arg6: memref<3xf32, #tpu.memory_space<smem>>, %arg7: memref<8x128xf32, #tpu.memory_space<vmem>>) attributes {dimension_semantics = [#tpu.dimension_semantics<arbitrary>], iteration_bounds = array<i64: 1>, scalar_prefetch = 0 : i64, scratch_operands = 1 : i64, tpu.core_type = #tpu.core_type<tc>, window_params = [{pipeline_mode = #tpu.pipeline_mode<synchronous>, transform_indices = @transform_0, window_bounds = array<i64: 8, 4>}, {pipeline_mode = #tpu.pipeline_mode<synchronous>, transform_indices = @transform_1, window_bounds = array<i64: 8, 1>}, {pipeline_mode = #tpu.pipeline_mode<synchronous>, transform_indices = @transform_2, window_bounds = array<i64: 1, 4>}, {transform_indices = @transform_3, window_bounds = array<i64: 4, 8, 128>}, {transform_indices = @transform_4, window_bounds = array<i64: 4, 8, 128>}, {transform_indices = @transform_5, window_bounds = array<i64: 3>}]} {
    %c0_i32 = arith.constant 0 : i32
    %0 = arith.cmpi eq, %arg0, %c0_i32 : i32
    %1 = arith.extui %0 : i1 to i32
    %c0_i32_0 = arith.constant 0 : i32
    %2 = arith.cmpi ne, %1, %c0_i32_0 : i32
    scf.if %2 {
      %cst_12 = arith.constant 0.000000e+00 : f32
      %14 = vector.broadcast %cst_12 : f32 to vector<8x128xf32>
      %c0_13 = arith.constant 0 : index
      %c0_14 = arith.constant 0 : index
      %15 = vector.load %arg7[%c0_13, %c0_14] : memref<8x128xf32, #tpu.memory_space<vmem>>, vector<8x128xf32>
      tpu.vector_store %arg7[%c0_13, %c0_14], %14 {strides = array<i32>} : memref<8x128xf32, #tpu.memory_space<vmem>>, vector<8x128xf32>,
    } else {
    }
    %c0 = arith.constant 0 : index
    %c0_1 = arith.constant 0 : index
    %c0_2 = arith.constant 0 : index
    %3 = vector.load %arg4[%c0, %c0_1, %c0_2] : memref<4x8x128xf32, #tpu.memory_space<vmem>>, vector<4x8x128xf32>
    %c0_3 = arith.constant 0 : index
    %c0_4 = arith.constant 0 : index
    %c0_5 = arith.constant 0 : index
    %4 = vector.load %arg5[%c0_3, %c0_4, %c0_5] : memref<4x8x128xf32, #tpu.memory_space<vmem>>, vector<4x8x128xf32>
    %5 = arith.subf %3, %4 : vector<4x8x128xf32>
    %c0_6 = arith.constant 0 : index
    %c0_7 = arith.constant 0 : index
    %6 = vector.load %arg7[%c0_6, %c0_7] : memref<8x128xf32, #tpu.memory_space<vmem>>, vector<8x128xf32>
    %7 = arith.mulf %5, %5 : vector<4x8x128xf32>
    %cst = arith.constant dense<0.000000e+00> : vector<8x128xf32>
    %8 = vector.multi_reduction <add>, %7, %cst [0] : vector<4x8x128xf32> to vector<8x128xf32>
    %9 = arith.addf %6, %8 : vector<8x128xf32>
    %c0_8 = arith.constant 0 : index
    %c0_9 = arith.constant 0 : index
    %10 = vector.load %arg7[%c0_8, %c0_9] : memref<8x128xf32, #tpu.memory_space<vmem>>, vector<8x128xf32>
    tpu.vector_store %arg7[%c0_8, %c0_9], %9 {strides = array<i32>} : memref<8x128xf32, #tpu.memory_space<vmem>>, vector<8x128xf32>,
    %c0_i32_10 = arith.constant 0 : i32
    %11 = arith.cmpi eq, %arg0, %c0_i32_10 : i32
    %12 = arith.extui %11 : i1 to i32
    %c0_i32_11 = arith.constant 0 : i32
    %13 = arith.cmpi ne, %12, %c0_i32_11 : i32
    scf.if %13 {
      %c0_12 = arith.constant 0 : index
      %c0_13 = arith.constant 0 : index
      %14 = vector.load %arg1[%c0_12, %c0_13] : memref<8x4xf32, #tpu.memory_space<vmem>>, vector<8x4xf32>
      %c0_14 = arith.constant 0 : index
      %c0_15 = arith.constant 0 : index
      %15 = vector.load %arg2[%c0_14, %c0_15] : memref<8x1xi32, #tpu.memory_space<vmem>>, vector<8x1xi32>
      %c0_16 = arith.constant 0 : index
      %c0_17 = arith.constant 0 : index
      %16 = vector.load %arg3[%c0_16, %c0_17] : memref<1x4xf32, #tpu.memory_space<vmem>>, vector<1x4xf32>
      %cst_18 = arith.constant dense<0xFF800000> : vector<8xf32>
      %17 = vector.multi_reduction <maximumf>, %14, %cst_18 [1] : vector<8x4xf32> to vector<8xf32>
      %18 = vector.shape_cast %17 : vector<8xf32> to vector<8x1xf32>
      %19 = vector.broadcast %18 : vector<8x1xf32> to vector<8x4xf32>
      %20 = arith.subf %14, %19 : vector<8x4xf32>
      %21 = math.exp %20 : vector<8x4xf32>
      %cst_19 = arith.constant dense<0.000000e+00> : vector<8xf32>
      %22 = vector.multi_reduction <add>, %21, %cst_19 [1] : vector<8x4xf32> to vector<8xf32>
      %23 = vector.shape_cast %22 : vector<8xf32> to vector<8x1xf32>
      %24 = math.log %23 : vector<8x1xf32>
      %25 = arith.addf %24, %18 : vector<8x1xf32>
      %26 = tpu.iota {dimensions = array<i32: 1>} : vector<8x4xi32>
      %27 = vector.broadcast %15 : vector<8x1xi32> to vector<8x4xi32>
      %28 = arith.cmpi eq, %26, %27 : vector<8x4xi32>
      %29 = arith.extui %28 : vector<8x4xi1> to vector<8x4xi32>
      %30 = arith.sitofp %29 : vector<8x4xi32> to vector<8x4xf32>
      %31 = vector.broadcast %16 : vector<1x4xf32> to vector<8x4xf32>
      %32 = arith.mulf %30, %31 : vector<8x4xf32>
      %33 = vector.shape_cast %32 : vector<8x4xf32> to vector<1x8x4xf32>
      %cst_20 = arith.constant dense<0.000000e+00> : vector<1xf32>
      %34 = vector.multi_reduction <add>, %33, %cst_20 [1, 2] : vector<1x8x4xf32> to vector<1xf32>
      %35 = vector.shape_cast %34 : vector<1xf32> to vector<1x1x1xf32>
      %36 = vector.extract %35[0, 0, 0] : f32 from vector<1x1x1xf32>
      %37 = vector.broadcast %25 : vector<8x1xf32> to vector<8x4xf32>
      %38 = arith.subf %37, %14 : vector<8x4xf32>
      %39 = arith.mulf %32, %38 : vector<8x4xf32>
      %40 = vector.shape_cast %39 : vector<8x4xf32> to vector<1x8x4xf32>
      %cst_21 = arith.constant dense<0.000000e+00> : vector<1xf32>
      %41 = vector.multi_reduction <add>, %40, %cst_21 [1, 2] : vector<1x8x4xf32> to vector<1xf32>
      %42 = vector.shape_cast %41 : vector<1xf32> to vector<1x1x1xf32>
      %43 = vector.extract %42[0, 0, 0] : f32 from vector<1x1x1xf32>
      %44 = arith.divf %43, %36 : f32
      %c0_22 = arith.constant 0 : index
      %c0_23 = arith.constant 0 : index
      %45 = vector.load %arg7[%c0_22, %c0_23] : memref<8x128xf32, #tpu.memory_space<vmem>>, vector<8x128xf32>
      %46 = vector.shape_cast %45 : vector<8x128xf32> to vector<1x8x128xf32>
      %cst_24 = arith.constant dense<0.000000e+00> : vector<1xf32>
      %47 = vector.multi_reduction <add>, %46, %cst_24 [1, 2] : vector<1x8x128xf32> to vector<1xf32>
      %48 = vector.shape_cast %47 : vector<1xf32> to vector<1x1x1xf32>
      %49 = vector.extract %48[0, 0, 0] : f32 from vector<1x1x1xf32>
      %cst_25 = arith.constant 2.44140625E-4 : f32
      %50 = arith.mulf %49, %cst_25 : f32
      %cst_26 = arith.constant 0.699999988 : f32
      %51 = arith.mulf %cst_26, %44 : f32
      %cst_27 = arith.constant 3.000000e-01 : f32
      %52 = arith.mulf %cst_27, %50 : f32
      %53 = arith.addf %51, %52 : f32
      %c0_28 = arith.constant 0 : index
      %54 = memref.load %arg6[%c0_28] : memref<3xf32, #tpu.memory_space<smem>>
      memref.store %53, %arg6[%c0_28] : memref<3xf32, #tpu.memory_space<smem>>
      %c1 = arith.constant 1 : index
      %55 = memref.load %arg6[%c1] : memref<3xf32, #tpu.memory_space<smem>>
      memref.store %44, %arg6[%c1] : memref<3xf32, #tpu.memory_space<smem>>
      %c2 = arith.constant 2 : index
      %56 = memref.load %arg6[%c2] : memref<3xf32, #tpu.memory_space<smem>>
      memref.store %50, %arg6[%c2] : memref<3xf32, #tpu.memory_space<smem>>
    } else {
    }
    return
  }
  func.func @transform_0(%arg0: i32) -> (i32, i32) {
    %c0_i32 = arith.constant 0 : i32
    %c0_i32_0 = arith.constant 0 : i32
    %c0_i32_1 = arith.constant 0 : i32
    return %c0_i32, %c0_i32_0 : i32, i32
  }
  func.func @transform_1(%arg0: i32) -> (i32, i32) {
    %c0_i32 = arith.constant 0 : i32
    %c0_i32_0 = arith.constant 0 : i32
    %c0_i32_1 = arith.constant 0 : i32
    return %c0_i32, %c0_i32_0 : i32, i32
  }
  func.func @transform_2(%arg0: i32) -> (i32, i32) {
    %c0_i32 = arith.constant 0 : i32
    %c0_i32_0 = arith.constant 0 : i32
    %c0_i32_1 = arith.constant 0 : i32
    return %c0_i32, %c0_i32_0 : i32, i32
  }
  func.func @transform_3(%arg0: i32) -> (i32, i32, i32) {
    %c0_i32 = arith.constant 0 : i32
    %c0_i32_0 = arith.constant 0 : i32
    %c0_i32_1 = arith.constant 0 : i32
    return %arg0, %c0_i32, %c0_i32_0 : i32, i32, i32
  }
  func.func @transform_4(%arg0: i32) -> (i32, i32, i32) {
    %c0_i32 = arith.constant 0 : i32
    %c0_i32_0 = arith.constant 0 : i32
    %c0_i32_1 = arith.constant 0 : i32
    return %arg0, %c0_i32, %c0_i32_0 : i32, i32, i32
  }
  func.func @transform_5(%arg0: i32) -> i32 {
    %c0_i32 = arith.constant 0 : i32
    %c0_i32_0 = arith.constant 0 : i32
    return %c0_i32 : i32
  }
}

</mosaic_0001>

<bundles_post_ra>
// kernel: two_head_loss_fused.1
= control target key start
LH: loop header
LB: loop body
LE: loop exit
PB: predicated region body
PF: predicated region fallthrough
CT: control target
= control target key end

     0   :  { %vm54_vm0 = vcmask 31744   ;;  %s250_s0 = inlined_call_operand.vmem [shape: f32[8,4], index: 0, kind: input, shape index: {}]   ;;  %s251_s1 = inlined_call_operand.vmem [shape: s32[8,1], index: 1, kind: input, shape index: {}]   ;;  %s252_s2 = inlined_call_operand.vmem [shape: f32[1,4], index: 2, kind: input, shape index: {}]   ;;  %s253_s3 = inlined_call_operand.vmem [shape: f32[4,8,128], index: 3, kind: input, shape index: {}]   ;;  %s254_s4 = inlined_call_operand.vmem [shape: f32[4,8,128], index: 4, kind: input, shape index: {}]   ;;  %s255_s5 = inlined_call_operand.vmem [shape: f32[3], index: 5, kind: output, shape index: {}]  }
   0x1   :  { %v51_v0 = vld [vmem:[%s250_s0] sm:$0xff] }
   0x2   :  { %10 = vsyncpa [#allocation4], 0  ;;  %v55_v1 = vsel %vm54_vm0, %v51_v0, -inf  ;;  %v177_v2 = vmov 0   ;;  %v52_v3 = vld [vmem:[%s251_s1] sm:$0xff]  ;;  %v67_v7 = vlaneseq  ;;  %v178_v10 = vmov 0.0  }
   0x3   :  { %156 = vset.pattern.permute.xlu0 %v177_v2  ;;  %v144_v12 = vld [vmem:[%s252_s2] ss:$0 sm:$0xff]  ;;  %v27_v20 = vld [vmem:[%s253_s3 + $0x8] sm:$0xff]  ;;  %v28_v27 = vld [vmem:[%s253_s3 + $0x10] sm:$0xff]  ;;  %s134_s18 = sshll.u32 %s255_s5, 4  ;;  %s135_s18 = int_to_ptr.vmem [resolvable:$true] %s134_s18 }
   0x4   :  { %56 = vmax.xlane.f32.xlu0 %v55_v1  ;;  %v68_v8 = vand.u32 127, %v67_v7  ;;  %v26_v18 = vld [vmem:[%s253_s3] sm:$0xff]  ;;  %v31_v22 = vld [vmem:[%s254_s4 + $0x8] sm:$0xff]  ;;  %v32_v28 = vld [vmem:[%s254_s4 + $0x10] sm:$0xff]  ;;  %s163_s0 = scalar_lea.vmem %s135_s18, 16  ;;  %p168_p1 = scmp.lt.s32.totalorder %s135_s18, %s135_s18 }
   0x5   :  { %v30_v21 = vld [vmem:[%s254_s4] sm:$0xff]  ;;  %v35_v26 = vsub.f32 %v27_v20, %v31_v22  ;;  %v36_v31 = vsub.f32 %v28_v27, %v32_v28  ;;  %v29_v34 = vld [vmem:[%s253_s3 + $0x18] sm:$0xff]  ;;  %p164_p0 = scmp.ne.s32.totalorder %s135_s18, %s163_s0  ;;  %p169_p2 = scmp.lt.s32.totalorder %s163_s0, %s163_s0 }
   0x6   :  { %v34_v25 = vsub.f32 %v26_v18, %v30_v21  ;;  %v33_v35 = vld [vmem:[%s254_s4 + $0x18] sm:$0xff] }
   0x7   :  { %v40_v33 = vmul.f32 %v35_v26, %v35_v26  ;;  %v37_v40 = vsub.f32 %v29_v34, %v33_v35  ;;  %v41_v41 = vmul.f32 %v36_v31, %v36_v31  ;;  %p170_p3 = por %p169_p2, %p168_p1 }
   0x8   :  { %v39_v32 = vmul.f32 %v34_v25, %v34_v25 }
   0x9   :  { %v42_v45 = vmul.f32 %v37_v40, %v37_v40  ;;  %p171_p4 = pnand %p170_p3, %p164_p0 }
   0xa   :  { %v43_v42 = vadd.f32 %v40_v33, %v39_v32 }
   0xc   :  { %v44_v46 = vadd.f32 %v43_v42, %v41_v41 }
   0xe   :  { %v45_v49 = vadd.f32 %v44_v46, %v42_v45 }
  0x1a   :  { %70 = vperm.xlu0 %156, %v52_v3  }
  0x8d   :  { %v57_v4 = vpop.xlane.xlu0 %56 }
  0x8e   :  { %v58_v5 = vsub.f32 %v51_v0, %v57_v4 }
  0x90   :  { %v59_v6 = vmul.f32 1.442695, %v58_v5 }
  0x92   :  { %157 = vpow2.f32 %v59_v6 }
  0x95   :  { %v71_v9 = vpop.permute.xlu0 %70 }
  0x96   :  { %vm72_vm1 = vcmp.eq.s32.totalorder %v68_v8, %v71_v9 }
  0x97   :  { %v143_v11 = vsel %vm72_vm1, 1.0, %v178_v10 }
  0x98   :  { %v81_v13 = vmul.f32 %v144_v12, %v143_v11 }
  0x9a   :  { %v82_v16 = vsel %vm54_vm0, %v81_v13, 0.0 }
  0x9f   :  { %v158_v14 = vpop.eup %157 }
  0xa0   :  { %v61_v15 = vsel %vm54_vm0, %v158_v14, 0.0 }
  0xa1   :  { %62 = vadd.xlane.f32.xlu1 %v61_v15 }
  0xa5   :  { %83 = vadd.xlane.f32.xlu1 %v82_v16 }
 0x12a   :  { %v63_v17 = vpop.xlane.xlu1 %62 }
 0x12b   :  { %159 = vlog2.f32 %v63_v17 }
 0x12e   :  { %v84_v19 = vpop.xlane.xlu1 %83 }
 0x12f   :  { %v85_v23 = vrot.slane %v84_v19, 4 }
 0x131   :  { %v86_v24 = vadd.f32 %v85_v23, %v84_v19 }
 0x133   :  { %v87_v29 = vrot.slane %v86_v24, 2 }
 0x135   :  { %v88_v30 = vadd.f32 %v87_v29, %v86_v24 }
 0x137   :  { %v89_v36 = vrot.slane %v88_v30, 1 }
 0x138   :  { %v160_v37 = vpop.eup %159 }
 0x139   :  { %v65_v38 = vmul.f32 0.6931472, %v160_v37  ;;  %v90_v39 = vadd.f32 %v89_v36, %v88_v30 }
 0x13b   :  { %v66_v43 = vadd.f32 %v65_v38, %v57_v4  ;;  %145 = vpush %v90_v39 }
 0x13d   :  { %v92_v44 = vsub.f32 %v66_v43, %v51_v0 }
 0x13f   :  { %v93_v47 = vmul.f32 %v92_v44, %v81_v13 }
 0x141   :  { %v94_v48 = vsel %vm54_vm0, %v93_v47, 0.0 }
 0x142   :  { %95 = vadd.xlane.f32.xlu1 %v94_v48 }
 0x146   :  { %109 = vadd.xlane.f32.xlu1 %v45_v49 }
 0x16c   :  { %s146_s3 = spop %145 }
 0x16d   :  { %v104_v50 = vstv %s146_s3 }
 0x16e   :  { %161 = vrcp.f32 %v104_v50 }
 0x17b   :  { %v162_v63 = vpop.eup %161 }
 0x1cb   :  { %v96_v51 = vpop.xlane.xlu1 %95 }
 0x1cc   :  { %v97_v52 = vrot.slane %v96_v51, 4 }
 0x1ce   :  { %v98_v53 = vadd.f32 %v97_v52, %v96_v51 }
 0x1cf   :  { %v110_v54 = vpop.xlane.xlu1 %109 }
 0x1d0   :  { %v99_v55 = vrot.slane %v98_v53, 2  ;;  %v111_v56 = vrot.slane %v110_v54, 4 }
 0x1d2   :  { %v112_v57 = vadd.f32 %v111_v56, %v110_v54  ;;  %v100_v58 = vadd.f32 %v99_v55, %v98_v53 }
 0x1d4   :  { %v113_v59 = vrot.slane %v112_v57, 2  ;;  %v101_v60 = vrot.slane %v100_v58, 1 }
 0x1d6   :  { %v114_v61 = vadd.f32 %v113_v59, %v112_v57  ;;  %v102_v62 = vadd.f32 %v101_v60, %v100_v58 }
 0x1d8   :  { %147 = vpush %v102_v62  ;;  %v115_v0 = vrot.slane %v114_v61, 1 }
 0x1d9   :  { %149 = vpush %v162_v63 }
 0x1da   :  { %v116_v1 = vadd.f32 %v115_v0, %v114_v61 }
 0x1dc   :  { %151 = vpush %v116_v1 }
 0x209   :  { %s148_s4 = spop %147 }
 0x20a   :  { %s150_s12 = spop %149 }
 0x20b   :  { %s107_s13 = smul.f32 %s150_s12, %s148_s4 }
 0x20d   :  { %125 = sst [smem:[#allocation3 + $0x1]] %s107_s13  ;;  %s152_s14 = spop %151 }
 0x20e   :  { %s118_s15 = smul.f32 0.00024414063, %s152_s14 }
 0x20f   :  { %s119_s19 = smul.f32 0.7, %s107_s13 }
 0x210   :  { %s120_s20 = smul.f32 0.3, %s118_s15  ;;  %127 = sst [smem:[#allocation3 + $0x2]] %s118_s15 }
 0x212   :  { %s121_s21 = sadd.f32 %s120_s20, %s119_s19 }
 0x214   :  { %123 = sst [smem:[#allocation3]] %s121_s21 }
 0x215   :  { %174 = shalt.err (!%p171_p4)
}
 0x216   :  { %s179_s22 = smov [#allocation3]  }
 0x217   :  { %137 = dma.smem_to_vmem %s179_s22, 16, %s135_s18, [#allocation4]  }
 0x218   :  { %175 = dma.done.wait [#allocation4], 16  }
 0x219   :  { %176 = vsyncadd [#allocation4], 4294967280 }
 0x21a   :  { %141 = sfence }
 0x21b   :  { %142 = vsyncpa [#allocation4], 1 }

</bundles_post_ra>
